<compile_context>
chip_gen: v7x
topology: tpu7x:2x2x1
jax: 0.10.0
libtpu: 0.0.40
codegen_flags: <defaults>
</compile_context>

<pallas_src>
import functools
import math

import jax
import jax.numpy as jnp
from jax.experimental import pallas as pl
from jax.experimental.pallas import tpu as pltpu


_ROW_GROUP = 32  # max rows whose partial sums are carried in vregs at once


def _sublane_fold(B, F, min_itemsize):
    """Smallest S with S | F and B*S a multiple of the sublane group.

    Folding (B, F) -> (B*S, F//S) fills all 8 (f32) / 16 (bf16) sublanes of
    every vreg and every DMA row burst when B is small.  Returns 1 when no
    such S exists (kernel stays correct, just sublane-sparse)."""
    if min_itemsize >= 4:
        subs = (8,)
    elif min_itemsize == 2:
        subs = (16, 8)
    else:
        subs = (32, 16, 8)
    for sub in subs:
        if B % sub == 0:
            return 1
        s = sub // math.gcd(B, sub)
        # Any multiple of s dividing F implies s | F, so checking s suffices.
        if F % s == 0:
            return s
    return 1


def _vmem_cap_bytes():
    """Per-core VMEM budget: ~75% of physical, never above 96 MiB.

    128 MiB parts (v5e/v6e) -> 96 MiB, v7x (64 MiB/core) -> 48 MiB; falls
    back to the conservative 48 MiB if the hardware query is unavailable."""
    try:
        cap = int(pltpu.get_tpu_info().vmem_capacity_bytes)
        return max(min((cap * 3) // 4, 96 << 20), 16 << 20)
    except Exception:
        return 48 << 20


def _chunk_unroll(g_rows):
    if g_rows <= 8:
        return 8
    if g_rows <= 16:
        return 4
    return 2


def _make_sums_kernel(rows, f_inner, tile, num_tiles, acc_lanes):
    """Streaming five-sums kernel for static geometry (rows, f_inner, tile)."""
    ragged = (f_inner % tile) != 0
    n_full = tile // 128                    # 128-lane chunks in a full tile
    small_tail = tile - n_full * 128        # >0 only when tile == f_inner < 128
    rem = f_inner - (num_tiles - 1) * tile  # valid lanes in the last tile
    last_full = rem // 128
    last_tail_valid = rem % 128

    row_groups = [(r0, min(r0 + _ROW_GROUP, rows))
                  for r0 in range(0, rows, _ROW_GROUP)]

    def kernel(p_ref, l_ref, out_ref, acc_ref):
        j = pl.program_id(0)

        @pl.when(j == 0)
        def _init():
            acc_ref[...] = jnp.zeros_like(acc_ref)

        def accumulate(nfull128, tail_w, tail_valid):
            # Walk the tile once per (<= _ROW_GROUP)-row group; partials stay
            # in vregs and hit the VMEM accumulator only once per group.
            for r0, r1 in row_groups:
                nr = r1 - r0

                def load_pair(off, width):
                    p = p_ref[r0:r1, pl.ds(off, width)].astype(jnp.float32)
                    l = l_ref[r0:r1, pl.ds(off, width)].astype(jnp.float32)
                    return p, l

                def add5(c, p, l):
                    sp, sl_, spl, spp, sll = c
                    return (sp + p, sl_ + l, spl + p * l, spp + p * p, sll + l * l)

                carry = tuple(jnp.zeros((nr, acc_lanes), jnp.float32)
                              for _ in range(5))

                if nfull128 > 0:
                    def chunk(i, c):
                        off = pl.multiple_of(i * 128, 128)
                        p, l = load_pair(off, 128)
                        return add5(c, p, l)

                    if nfull128 <= 8:          # tiny tiles: fully static
                        for i in range(nfull128):
                            carry = chunk(i, carry)
                    else:                      # big tiles: rolled, modest unroll
                        carry = jax.lax.fori_loop(0, nfull128, chunk, carry,
                                                  unroll=_chunk_unroll(nr))

                if tail_w:
                    p, l = load_pair(nfull128 * 128, tail_w)
                    if tail_valid is not None:
                        # Edge block: lanes >= tail_valid hold unspecified VMEM
                        # data; zero BOTH operands so all five sums stay exact.
                        lane = jax.lax.broadcasted_iota(jnp.int32, (nr, tail_w), 1)
                        keep = lane < tail_valid
                        p = jnp.where(keep, p, 0.0)
                        l = jnp.where(keep, l, 0.0)
                    carry = add5(carry, p, l)

                for k in range(5):
                    acc_ref[k, r0:r1, :] += carry[k]

        if not ragged:
            accumulate(n_full, small_tail, None)
        else:
            last = num_tiles - 1

            @pl.when(j < last)
            def _full_tiles():
                accumulate(n_full, 0, None)

            @pl.when(j == last)   # ragged-tail work only on the last grid step
            def _last_tile():
                accumulate(last_full,
                           128 if last_tail_valid else 0,
                           last_tail_valid if last_tail_valid else None)

        @pl.when(j == num_tiles - 1)
        def _write():
            out_ref[...] = acc_ref[...]   # single writeback of the output block

    return kernel


def _ftnmt_sums(p2d, l2d, *, max_tile_lanes=None):
    """Per-batch [sum(p), sum(l), sum(p*l), sum(p*p), sum(l*l)] -> (5, B)."""
    B, F = p2d.shape
    its_p = jnp.dtype(p2d.dtype).itemsize
    its_l = jnp.dtype(l2d.dtype).itemsize
    itemsize = max(its_p, its_l)

    # (1) Sublane fold: (B, F) -> (rows, f_inner); free metadata reshape.
    S = _sublane_fold(B, F, min(its_p, its_l))
    rows, f_inner = B * S, F // S
    p2d = p2d.reshape(rows, f_inner)
    l2d = l2d.reshape(rows, f_inner)

    acc_lanes = 128 if f_inner >= 128 else f_inner
    acc_bytes = 5 * rows * max(acc_lanes, 128) * 4
    vmem_cap = _vmem_cap_bytes()

    # (2) Lane tile from the VMEM budget: target up to 4 MiB per input per
    #     pipeline buffer (2 inputs x 2 buffers), clamped to the VMEM cap.
    if f_inner < 128:
        tile = f_inner
    else:
        f_pad128 = ((f_inner + 127) // 128) * 128
        usable = max(vmem_cap - 2 * acc_bytes - (6 << 20), 1 << 20)
        per_buf = min(4 << 20, usable // 4)
        tile = (per_buf // (rows * itemsize)) // 128 * 128
        tile = max(128, min(tile, f_pad128))
        if max_tile_lanes is not None:  # test hook to force multi-tile grids
            tile = max(128, min(tile, (max_tile_lanes // 128) * 128))
    num_tiles = int(pl.cdiv(f_inner, tile))

    need = 2 * 2 * rows * tile * itemsize + 2 * acc_bytes + (4 << 20)
    vmem_limit = int(min(vmem_cap, max(need, 32 << 20)))

    kernel = _make_sums_kernel(rows, f_inner, tile, num_tiles, acc_lanes)

    out = pl.pallas_call(
        kernel,
        out_shape=jax.ShapeDtypeStruct((5, rows, acc_lanes), jnp.float32),
        grid=(num_tiles,),
        in_specs=[
            pl.BlockSpec((rows, tile), lambda j: (0, j)),
            pl.BlockSpec((rows, tile), lambda j: (0, j)),
        ],
        out_specs=pl.BlockSpec((5, rows, acc_lanes), lambda j: (0, 0, 0)),
        scratch_shapes=[pltpu.VMEM((5, rows, acc_lanes), jnp.float32)],
        compiler_params=pltpu.CompilerParams(
            dimension_semantics=("arbitrary",),   # streaming reduction axis
            vmem_limit_bytes=vmem_limit,
        ),
    )(p2d, l2d)

    # Fold the sublane split and the lane-dense partials: (5, rows, L) -> (5, B).
    return jnp.sum(out.reshape(5, B, S, acc_lanes), axis=(2, 3))


def ftnmt_loss(preds, labels, *, depth=5, smooth=1e-5, max_tile_lanes=None):
    """Forward pass of ftnmt_loss (reduction over axis=[1, 2, 3]) -> scalar."""
    assert depth >= 0, "depth must be >= 0"
    depth_eff = max(depth, 1)
    scale = 1.0 / depth_eff

    B = preds.shape[0]
    N = 1
    for d in preds.shape[1:]:
        N *= d

    p2d = preds.reshape(B, -1)
    l2d = labels.reshape(B, -1)

    sums = _ftnmt_sums(p2d, l2d, max_tile_lanes=max_tile_lanes)
    s_p, s_l, s_pl, s_pp, s_ll = (sums[i] for i in range(5))

    # Complement sums derived exactly from the direct sums:
    #   sum((1-p)(1-l)) = N - sum(p) - sum(l) + sum(p*l)
    #   sum((1-p)^2)    = N - 2*sum(p) + sum(p*p)
    #   sum((1-l)^2)    = N - 2*sum(l) + sum(l*l)
    Nf = jnp.float32(N)
    c_pl = Nf - s_p - s_l + s_pl
    c_pp = Nf - 2.0 * s_p + s_pp
    c_ll = Nf - 2.0 * s_l + s_ll

    def tnmt_base(tpl, tpp, tll):
        num = tpl + smooth
        denum = jnp.zeros_like(tpl)
        for d in range(depth_eff):
            a = 2.0 ** d
            b = -(2.0 * a - 1.0)
            denum = denum + 1.0 / (a * (tpp + tll) + b * tpl + smooth)
        return jnp.mean(num * denum * scale, axis=0)

    l1 = tnmt_base(s_pl, s_pp, s_ll)
    l2 = tnmt_base(c_pl, c_pp, c_ll)
    return 1.0 - 0.5 * (l1 + l2)


def _ftnmt_loss_ref(preds, labels, depth=5, smooth=1e-5):
    """Pure-JAX reference mirroring the PyTorch module (sanity check)."""
    if depth == 0:
        depth = 1
    scale = 1.0 / depth
    axis = tuple(range(1, preds.ndim))

    def base(p, l):
        tpl = jnp.sum(p * l, axis=axis)
        tpp = jnp.sum(p * p, axis=axis)
        tll = jnp.sum(l * l, axis=axis)
        num = tpl + smooth
        denum = 0.0
        for d in range(depth):
            a = 2.0 ** d
            b = -(2.0 * a - 1.0)
            denum = denum + 1.0 / (a * (tpp + tll) + b * tpl + smooth)
        return jnp.mean(num * denum * scale, axis=0)

    l1 = base(preds, labels)
    l2 = base(1.0 - preds, 1.0 - labels)
    return 1.0 - 0.5 * (l1 + l2)


if __name__ == "__main__":
    root = jax.random.PRNGKey(0)

    def check(idx, shape, *, dtype=jnp.float32, rtol=1e-5, atol=1e-5, **kw):
        k1, k2 = jax.random.split(jax.random.fold_in(root, idx))
        preds = jax.nn.sigmoid(jax.random.normal(k1, shape, jnp.float32)).astype(dtype)
        labels = (jax.random.uniform(k2, shape) > 0.5).astype(dtype)
        fn = jax.jit(functools.partial(ftnmt_loss, depth=5, smooth=1e-5, **kw))
        loss = jax.block_until_ready(fn(preds, labels))
        ref = _ftnmt_loss_ref(preds.astype(jnp.float32), labels.astype(jnp.float32),
                              depth=5, smooth=1e-5)
        assert jnp.allclose(loss, ref, rtol=rtol, atol=atol), (shape, kw, loss, ref)
        return loss

    # Primary NCHW shape implied by the module (batch=2, channels=4, 16x16).
    check(0, (2, 4, 16, 16))                          # folded rows, static chunk walk
    check(1, (2, 4, 64, 64))                          # folded rows, fori_loop chunk walk
    check(2, (2, 4, 64, 64), max_tile_lanes=1024)     # multi-tile grid accumulation
    check(3, (2, 3, 11, 13), max_tile_lanes=256)      # unfolded rows, ragged + masked tail
    check(4, (2, 4, 16, 16), dtype=jnp.bfloat16, rtol=1e-3, atol=1e-3)  # native bf16 DMA

    print("KERNEL_OK")
</pallas_src>

<mosaic_0001>
module attributes {stable_mosaic.version = 11 : i64} {
  func.func @kernel(%arg0: i32, %arg1: memref<8x256xf32, #tpu.memory_space<vmem>>, %arg2: memref<8x256xf32, #tpu.memory_space<vmem>>, %arg3: memref<5x8x128xf32, #tpu.memory_space<vmem>>, %arg4: memref<5x8x128xf32, #tpu.memory_space<vmem>>) attributes {dimension_semantics = [#tpu.dimension_semantics<arbitrary>], iteration_bounds = array<i64: 1>, scalar_prefetch = 0 : i64, scratch_operands = 1 : i64, tpu.core_type = #tpu.core_type<tc>, window_params = [{transform_indices = @transform_0, window_bounds = array<i64: 8, 256>}, {transform_indices = @transform_1, window_bounds = array<i64: 8, 256>}, {pipeline_mode = #tpu.pipeline_mode<synchronous>, transform_indices = @transform_2, window_bounds = array<i64: 5, 8, 128>}]} {
    %c0_i32 = arith.constant 0 : i32
    %0 = arith.cmpi eq, %arg0, %c0_i32 : i32
    %1 = arith.extui %0 : i1 to i32
    %c0_i32_0 = arith.constant 0 : i32
    %2 = arith.cmpi ne, %1, %c0_i32_0 : i32
    scf.if %2 {
      %cst_37 = arith.constant 0.000000e+00 : f32
      %67 = vector.broadcast %cst_37 : f32 to vector<5x8x128xf32>
      %c0_38 = arith.constant 0 : index
      %c0_39 = arith.constant 0 : index
      %c0_40 = arith.constant 0 : index
      %68 = vector.load %arg4[%c0_38, %c0_39, %c0_40] : memref<5x8x128xf32, #tpu.memory_space<vmem>>, vector<5x8x128xf32>
      tpu.vector_store %arg4[%c0_38, %c0_39, %c0_40], %67 {strides = array<i32>} : memref<5x8x128xf32, #tpu.memory_space<vmem>>, vector<5x8x128xf32>,
    } else {
    }
    %cst = arith.constant 0.000000e+00 : f32
    %3 = vector.broadcast %cst : f32 to vector<8x128xf32>
    %cst_1 = arith.constant 0.000000e+00 : f32
    %4 = vector.broadcast %cst_1 : f32 to vector<8x128xf32>
    %cst_2 = arith.constant 0.000000e+00 : f32
    %5 = vector.broadcast %cst_2 : f32 to vector<8x128xf32>
    %cst_3 = arith.constant 0.000000e+00 : f32
    %6 = vector.broadcast %cst_3 : f32 to vector<8x128xf32>
    %cst_4 = arith.constant 0.000000e+00 : f32
    %7 = vector.broadcast %cst_4 : f32 to vector<8x128xf32>
    %c0_i32_5 = arith.constant 0 : i32
    %8 = tpu.assume_multiple %c0_i32_5, 128 : i32
    %c0 = arith.constant 0 : index
    %9 = arith.index_cast %8 : i32 to index
    %10 = vector.load %arg1[%c0, %9] : memref<8x256xf32, #tpu.memory_space<vmem>>, vector<8x128xf32>
    %c0_6 = arith.constant 0 : index
    %11 = arith.index_cast %8 : i32 to index
    %12 = vector.load %arg2[%c0_6, %11] : memref<8x256xf32, #tpu.memory_space<vmem>>, vector<8x128xf32>
    %13 = arith.addf %3, %10 : vector<8x128xf32>
    %14 = arith.addf %4, %12 : vector<8x128xf32>
    %15 = arith.mulf %10, %12 : vector<8x128xf32>
    %16 = arith.addf %5, %15 : vector<8x128xf32>
    %17 = arith.mulf %10, %10 : vector<8x128xf32>
    %18 = arith.addf %6, %17 : vector<8x128xf32>
    %19 = arith.mulf %12, %12 : vector<8x128xf32>
    %20 = arith.addf %7, %19 : vector<8x128xf32>
    %c128_i32 = arith.constant 128 : i32
    %21 = tpu.assume_multiple %c128_i32, 128 : i32
    %c0_7 = arith.constant 0 : index
    %22 = arith.index_cast %21 : i32 to index
    %23 = vector.load %arg1[%c0_7, %22] : memref<8x256xf32, #tpu.memory_space<vmem>>, vector<8x128xf32>
    %c0_8 = arith.constant 0 : index
    %24 = arith.index_cast %21 : i32 to index
    %25 = vector.load %arg2[%c0_8, %24] : memref<8x256xf32, #tpu.memory_space<vmem>>, vector<8x128xf32>
    %26 = arith.addf %13, %23 : vector<8x128xf32>
    %27 = arith.addf %14, %25 : vector<8x128xf32>
    %28 = arith.mulf %23, %25 : vector<8x128xf32>
    %29 = arith.addf %16, %28 : vector<8x128xf32>
    %30 = arith.mulf %23, %23 : vector<8x128xf32>
    %31 = arith.addf %18, %30 : vector<8x128xf32>
    %32 = arith.mulf %25, %25 : vector<8x128xf32>
    %33 = arith.addf %20, %32 : vector<8x128xf32>
    %c0_9 = arith.constant 0 : index
    %c0_10 = arith.constant 0 : index
    %c0_11 = arith.constant 0 : index
    %34 = vector.load %arg4[%c0_9, %c0_10, %c0_11] : memref<5x8x128xf32, #tpu.memory_space<vmem>>, vector<1x8x128xf32>
    %35 = vector.shape_cast %34 : vector<1x8x128xf32> to vector<8x128xf32>
    %36 = arith.addf %35, %26 : vector<8x128xf32>
    %c0_12 = arith.constant 0 : index
    %c0_13 = arith.constant 0 : index
    %c0_14 = arith.constant 0 : index
    %37 = vector.load %arg4[%c0_12, %c0_13, %c0_14] : memref<5x8x128xf32, #tpu.memory_space<vmem>>, vector<1x8x128xf32>
    %38 = vector.shape_cast %37 : vector<1x8x128xf32> to vector<8x128xf32>
    %39 = vector.shape_cast %36 : vector<8x128xf32> to vector<1x8x128xf32>
    tpu.vector_store %arg4[%c0_12, %c0_13, %c0_14], %39 {strides = array<i32>} : memref<5x8x128xf32, #tpu.memory_space<vmem>>, vector<1x8x128xf32>,
    %c1 = arith.constant 1 : index
    %c0_15 = arith.constant 0 : index
    %c0_16 = arith.constant 0 : index
    %40 = vector.load %arg4[%c1, %c0_15, %c0_16] : memref<5x8x128xf32, #tpu.memory_space<vmem>>, vector<1x8x128xf32>
    %41 = vector.shape_cast %40 : vector<1x8x128xf32> to vector<8x128xf32>
    %42 = arith.addf %41, %27 : vector<8x128xf32>
    %c1_17 = arith.constant 1 : index
    %c0_18 = arith.constant 0 : index
    %c0_19 = arith.constant 0 : index
    %43 = vector.load %arg4[%c1_17, %c0_18, %c0_19] : memref<5x8x128xf32, #tpu.memory_space<vmem>>, vector<1x8x128xf32>
    %44 = vector.shape_cast %43 : vector<1x8x128xf32> to vector<8x128xf32>
    %45 = vector.shape_cast %42 : vector<8x128xf32> to vector<1x8x128xf32>
    tpu.vector_store %arg4[%c1_17, %c0_18, %c0_19], %45 {strides = array<i32>} : memref<5x8x128xf32, #tpu.memory_space<vmem>>, vector<1x8x128xf32>,
    %c2 = arith.constant 2 : index
    %c0_20 = arith.constant 0 : index
    %c0_21 = arith.constant 0 : index
    %46 = vector.load %arg4[%c2, %c0_20, %c0_21] : memref<5x8x128xf32, #tpu.memory_space<vmem>>, vector<1x8x128xf32>
    %47 = vector.shape_cast %46 : vector<1x8x128xf32> to vector<8x128xf32>
    %48 = arith.addf %47, %29 : vector<8x128xf32>
    %c2_22 = arith.constant 2 : index
    %c0_23 = arith.constant 0 : index
    %c0_24 = arith.constant 0 : index
    %49 = vector.load %arg4[%c2_22, %c0_23, %c0_24] : memref<5x8x128xf32, #tpu.memory_space<vmem>>, vector<1x8x128xf32>
    %50 = vector.shape_cast %49 : vector<1x8x128xf32> to vector<8x128xf32>
    %51 = vector.shape_cast %48 : vector<8x128xf32> to vector<1x8x128xf32>
    tpu.vector_store %arg4[%c2_22, %c0_23, %c0_24], %51 {strides = array<i32>} : memref<5x8x128xf32, #tpu.memory_space<vmem>>, vector<1x8x128xf32>,
    %c3 = arith.constant 3 : index
    %c0_25 = arith.constant 0 : index
    %c0_26 = arith.constant 0 : index
    %52 = vector.load %arg4[%c3, %c0_25, %c0_26] : memref<5x8x128xf32, #tpu.memory_space<vmem>>, vector<1x8x128xf32>
    %53 = vector.shape_cast %52 : vector<1x8x128xf32> to vector<8x128xf32>
    %54 = arith.addf %53, %31 : vector<8x128xf32>
    %c3_27 = arith.constant 3 : index
    %c0_28 = arith.constant 0 : index
    %c0_29 = arith.constant 0 : index
    %55 = vector.load %arg4[%c3_27, %c0_28, %c0_29] : memref<5x8x128xf32, #tpu.memory_space<vmem>>, vector<1x8x128xf32>
    %56 = vector.shape_cast %55 : vector<1x8x128xf32> to vector<8x128xf32>
    %57 = vector.shape_cast %54 : vector<8x128xf32> to vector<1x8x128xf32>
    tpu.vector_store %arg4[%c3_27, %c0_28, %c0_29], %57 {strides = array<i32>} : memref<5x8x128xf32, #tpu.memory_space<vmem>>, vector<1x8x128xf32>,
    %c4 = arith.constant 4 : index
    %c0_30 = arith.constant 0 : index
    %c0_31 = arith.constant 0 : index
    %58 = vector.load %arg4[%c4, %c0_30, %c0_31] : memref<5x8x128xf32, #tpu.memory_space<vmem>>, vector<1x8x128xf32>
    %59 = vector.shape_cast %58 : vector<1x8x128xf32> to vector<8x128xf32>
    %60 = arith.addf %59, %33 : vector<8x128xf32>
    %c4_32 = arith.constant 4 : index
    %c0_33 = arith.constant 0 : index
    %c0_34 = arith.constant 0 : index
    %61 = vector.load %arg4[%c4_32, %c0_33, %c0_34] : memref<5x8x128xf32, #tpu.memory_space<vmem>>, vector<1x8x128xf32>
    %62 = vector.shape_cast %61 : vector<1x8x128xf32> to vector<8x128xf32>
    %63 = vector.shape_cast %60 : vector<8x128xf32> to vector<1x8x128xf32>
    tpu.vector_store %arg4[%c4_32, %c0_33, %c0_34], %63 {strides = array<i32>} : memref<5x8x128xf32, #tpu.memory_space<vmem>>, vector<1x8x128xf32>,
    %c0_i32_35 = arith.constant 0 : i32
    %64 = arith.cmpi eq, %arg0, %c0_i32_35 : i32
    %65 = arith.extui %64 : i1 to i32
    %c0_i32_36 = arith.constant 0 : i32
    %66 = arith.cmpi ne, %65, %c0_i32_36 : i32
    scf.if %66 {
      %c0_37 = arith.constant 0 : index
      %c0_38 = arith.constant 0 : index
      %c0_39 = arith.constant 0 : index
      %67 = vector.load %arg4[%c0_37, %c0_38, %c0_39] : memref<5x8x128xf32, #tpu.memory_space<vmem>>, vector<5x8x128xf32>
      %c0_40 = arith.constant 0 : index
      %c0_41 = arith.constant 0 : index
      %c0_42 = arith.constant 0 : index
      %68 = vector.load %arg3[%c0_40, %c0_41, %c0_42] : memref<5x8x128xf32, #tpu.memory_space<vmem>>, vector<5x8x128xf32>
      tpu.vector_store %arg3[%c0_40, %c0_41, %c0_42], %67 {strides = array<i32>} : memref<5x8x128xf32, #tpu.memory_space<vmem>>, vector<5x8x128xf32>,
    } else {
    }
    return
  }
  func.func @transform_0(%arg0: i32) -> (i32, i32) {
    %c0_i32 = arith.constant 0 : i32
    %c0_i32_0 = arith.constant 0 : i32
    return %c0_i32, %arg0 : i32, i32
  }
  func.func @transform_1(%arg0: i32) -> (i32, i32) {
    %c0_i32 = arith.constant 0 : i32
    %c0_i32_0 = arith.constant 0 : i32
    return %c0_i32, %arg0 : i32, i32
  }
  func.func @transform_2(%arg0: i32) -> (i32, i32, i32) {
    %c0_i32 = arith.constant 0 : i32
    %c0_i32_0 = arith.constant 0 : i32
    %c0_i32_1 = arith.constant 0 : i32
    %c0_i32_2 = arith.constant 0 : i32
    return %c0_i32, %c0_i32_0, %c0_i32_1 : i32, i32, i32
  }
}

</mosaic_0001>

<bundles_post_ra>
// kernel: ftnmt_loss.1
= control target key start
LH: loop header
LB: loop body
LE: loop exit
PB: predicated region body
PF: predicated region fallthrough
CT: control target
= control target key end

     0   :  { %s122_s0 = inlined_call_operand.vmem [shape: f32[8,256], index: 0, kind: input, shape index: {}]   ;;  %s123_s1 = inlined_call_operand.vmem [shape: f32[8,256], index: 1, kind: input, shape index: {}]   ;;  %s124_s2 = inlined_call_operand.vmem [shape: f32[5,8,128], index: 2, kind: output, shape index: {}]  }
   0x1   :  { %v20_v0 = vld [vmem:[%s122_s0] sm:$0xff]  ;;  %v78_v1 = vld [vmem:[%s122_s0 + $0x8] sm:$0xff] }
   0x2   :  { %v21_v2 = vld [vmem:[%s123_s1] sm:$0xff]  ;;  %v34_v3 = vadd.f32 %v78_v1, %v20_v0  ;;  %v79_v4 = vld [vmem:[%s123_s1 + $0x8] sm:$0xff]  ;;  %v26_v6 = vmul.f32 %v20_v0, %v20_v0  ;;  %v38_v7 = vmul.f32 %v78_v1, %v78_v1 }
   0x3   :  { %v24_v5 = vmul.f32 %v21_v2, %v20_v0  ;;  %v35_v8 = vadd.f32 %v79_v4, %v21_v2  ;;  %v36_v9 = vmul.f32 %v79_v4, %v78_v1  ;;  %v28_v10 = vmul.f32 %v21_v2, %v21_v2 }
   0x4   :  { %v40_v11 = vmul.f32 %v79_v4, %v79_v4  ;;  %69 = vst [vmem:[%s124_s2] sm:$0xff] %v34_v3  ;;  %v39_v12 = vadd.f32 %v38_v7, %v26_v6 }
   0x5   :  { %70 = vst [vmem:[%s124_s2 + $0x8] sm:$0xff] %v35_v8  ;;  %v37_v13 = vadd.f32 %v36_v9, %v24_v5 }
   0x6   :  { %v41_v14 = vadd.f32 %v40_v11, %v28_v10  ;;  %72 = vst [vmem:[%s124_s2 + $0x18] sm:$0xff] %v39_v12 }
   0x7   :  { %71 = vst [vmem:[%s124_s2 + $0x10] sm:$0xff] %v37_v13 }
   0x8   :  { %73 = vst [vmem:[%s124_s2 + $0x20] sm:$0xff] %v41_v14 }

</bundles_post_ra>
